<compile_context>
chip_gen: v7x
topology: tpu7x:2x2x1
jax: 0.10.0
libtpu: 0.0.40
codegen_flags: <defaults>
</compile_context>

<pallas_src>
import functools

import jax
import jax.numpy as jnp
from jax.experimental import pallas as pl
from jax.experimental.pallas import tpu as pltpu


def se_block_kernel(x_ref, w1t_ref, w2t_ref, o_ref, *, inv_hw):
    """One grid step: a (bt, C, HW) batch tile.

    x_ref  : (bt, C, HW)  input slab (native dtype; C on sublanes, HW on lanes)
    w1t_ref: (C, Cr)      first Linear weight, pre-transposed (Cr = C // r)
    w2t_ref: (Cr, C)      second Linear weight, pre-transposed
    o_ref  : (bt, C, HW)
    """
    xs = x_ref[...]                                          # (bt, C, HW)

    # Squeeze: global average pool with f32 accumulation -> (bt, C).
    pooled = jnp.sum(xs.astype(jnp.float32), axis=-1) * inv_hw

    # Excitation: two small MXU matmuls for the whole batch tile (row layout).
    w1t = w1t_ref[...].astype(jnp.float32)                   # (C, Cr)
    w2t = w2t_ref[...].astype(jnp.float32)                   # (Cr, C)
    h = jnp.maximum(
        jnp.dot(pooled, w1t, preferred_element_type=jnp.float32), 0.0)   # (bt, Cr)
    gate = jax.nn.sigmoid(
        jnp.dot(h, w2t, preferred_element_type=jnp.float32))             # (bt, C)

    # Scale: per-(b, c) gate broadcast over the spatial (lane) axis.
    # Multiply + store in the input dtype (keeps bf16 slabs bf16).
    o_ref[...] = (xs * gate[:, :, None].astype(xs.dtype)).astype(o_ref.dtype)


def _pick_batch_tile(B, per_image_bytes, *, target_block_bytes=2 << 20):
    """Largest divisor of B whose block stays under `target_block_bytes`."""
    best = 1
    for cand in range(1, B + 1):
        if B % cand == 0 and cand * per_image_bytes <= target_block_bytes:
            best = cand
    # Prefer >=2 grid steps (pipelining / v7x megacore) if blocks stay sizeable.
    if B // best == 1 and best % 2 == 0 and (best // 2) * per_image_bytes >= (128 << 10):
        best //= 2
    return best


def se_block(x, w1, w2):
    """x: (B, C, H, W).  w1: (C//r, C), w2: (C, C//r) — PyTorch nn.Linear layout."""
    B, C, H, W = x.shape
    Cr = w1.shape[0]
    assert w1.shape == (Cr, C) and w2.shape == (C, Cr)

    HW = H * W
    # Free reshapes only: collapse (H, W) -> HW; no padding, no extra HBM passes.
    x3 = x.reshape(B, C, HW)
    w1t = jnp.transpose(w1)            # (C, Cr)  tiny
    w2t = jnp.transpose(w2)            # (Cr, C)  tiny

    itemsize = jnp.dtype(x.dtype).itemsize
    per_image_bytes = C * HW * itemsize
    bt = _pick_batch_tile(B, per_image_bytes)

    # Explicit VMEM budget: double-buffered input + output blocks + weights +
    # slack.  Clamp to [16 MiB, 48 MiB] so it fits v5e's scoped default and
    # stays under v7x's 64 MiB physical VMEM.
    block_bytes = bt * per_image_bytes
    w_bytes = 4 * (w1.size + w2.size)
    vmem_limit = int(min(max(4 * block_bytes + 4 * w_bytes + (4 << 20), 16 << 20),
                         48 << 20))

    kernel = functools.partial(se_block_kernel, inv_hw=1.0 / float(HW))

    out3 = pl.pallas_call(
        kernel,
        out_shape=jax.ShapeDtypeStruct((B, C, HW), x.dtype),
        grid_spec=pltpu.PrefetchScalarGridSpec(
            num_scalar_prefetch=0,
            grid=(B // bt,),
            in_specs=[
                # Last two block dims equal the full array dims -> always legal,
                # and each block is one contiguous HBM chunk.
                pl.BlockSpec((bt, C, HW), lambda i: (i, 0, 0)),
                pl.BlockSpec((C, Cr), lambda i: (0, 0)),   # tiny, resident
                pl.BlockSpec((Cr, C), lambda i: (0, 0)),   # tiny, resident
            ],
            out_specs=pl.BlockSpec((bt, C, HW), lambda i: (i, 0, 0)),
        ),
        compiler_params=pltpu.CompilerParams(
            dimension_semantics=("parallel",),
            vmem_limit_bytes=vmem_limit,
        ),
    )(x3, w1t, w2t)

    return out3.reshape(B, C, H, W)


def se_block_ref(x, w1, w2):
    """Pure-JAX reference mirroring the PyTorch module."""
    y = jnp.mean(x, axis=(2, 3))                     # (B, C)
    y = jnp.maximum(y @ w1.T, 0.0)                   # (B, C//r)
    y = jax.nn.sigmoid(y @ w2.T)                     # (B, C)
    return x * y[:, :, None, None]


if __name__ == "__main__":
    key = jax.random.PRNGKey(0)
    k_x, k_w1, k_w2 = jax.random.split(key, 3)

    B, C, H, W = 2, 64, 8, 8
    r = 16
    Cr = C // r                                      # 4

    x = jax.random.normal(k_x, (B, C, H, W), dtype=jnp.float32)
    # Deterministic synthetic weights (nn.Linear(c, c//r) / nn.Linear(c//r, c)).
    w1 = jax.random.normal(k_w1, (Cr, C), dtype=jnp.float32) * 0.1
    w2 = jax.random.normal(k_w2, (C, Cr), dtype=jnp.float32) * 0.1

    out = jax.block_until_ready(se_block(x, w1, w2))
    ref = se_block_ref(x, w1, w2)

    assert out.shape == (B, C, H, W)
    assert jnp.allclose(out, ref, atol=1e-5, rtol=1e-5), "mismatch vs reference"

    print("KERNEL_OK")
</pallas_src>

<mosaic_0001>
module attributes {stable_mosaic.version = 11 : i64} {
  func.func @se_block_kernel(%arg0: i32, %arg1: memref<2x64x64xf32, #tpu.memory_space<vmem>>, %arg2: memref<64x4xf32, #tpu.memory_space<vmem>>, %arg3: memref<4x64xf32, #tpu.memory_space<vmem>>, %arg4: memref<2x64x64xf32, #tpu.memory_space<vmem>>) attributes {dimension_semantics = [#tpu.dimension_semantics<parallel>], iteration_bounds = array<i64: 1>, scalar_prefetch = 0 : i64, scratch_operands = 0 : i64, tpu.core_type = #tpu.core_type<tc>, window_params = [{transform_indices = @transform_0, window_bounds = array<i64: 2, 64, 64>}, {pipeline_mode = #tpu.pipeline_mode<synchronous>, transform_indices = @transform_1, window_bounds = array<i64: 64, 4>}, {pipeline_mode = #tpu.pipeline_mode<synchronous>, transform_indices = @transform_2, window_bounds = array<i64: 4, 64>}, {transform_indices = @transform_3, window_bounds = array<i64: 2, 64, 64>}]} {
    %c0 = arith.constant 0 : index
    %c0_0 = arith.constant 0 : index
    %c0_1 = arith.constant 0 : index
    %0 = vector.load %arg1[%c0, %c0_0, %c0_1] : memref<2x64x64xf32, #tpu.memory_space<vmem>>, vector<2x64x64xf32>
    %cst = arith.constant dense<0.000000e+00> : vector<2x64xf32>
    %1 = vector.multi_reduction <add>, %0, %cst [2] : vector<2x64x64xf32> to vector<2x64xf32>
    %cst_2 = arith.constant 1.562500e-02 : f32
    %2 = vector.broadcast %cst_2 : f32 to vector<2x64xf32>
    %3 = arith.mulf %1, %2 : vector<2x64xf32>
    %c0_3 = arith.constant 0 : index
    %c0_4 = arith.constant 0 : index
    %4 = vector.load %arg2[%c0_3, %c0_4] : memref<64x4xf32, #tpu.memory_space<vmem>>, vector<64x4xf32>
    %c0_5 = arith.constant 0 : index
    %c0_6 = arith.constant 0 : index
    %5 = vector.load %arg3[%c0_5, %c0_6] : memref<4x64xf32, #tpu.memory_space<vmem>>, vector<4x64xf32>
    %cst_7 = arith.constant dense<0.000000e+00> : vector<2x4xf32>
    %6 = tpu.matmul %3, %4, %cst_7 {dimension_numbers = #tpu.dot_dimension_numbers<[1], [0], [0], [1], [0, 0, 1, 1], [], []>} : vector<2x64xf32>, vector<64x4xf32>, vector<2x4xf32> -> vector<2x4xf32>
    %cst_8 = arith.constant 0.000000e+00 : f32
    %7 = vector.broadcast %cst_8 : f32 to vector<2x4xf32>
    %8 = arith.maximumf %6, %7 : vector<2x4xf32>
    %cst_9 = arith.constant dense<0.000000e+00> : vector<2x64xf32>
    %9 = tpu.matmul %8, %5, %cst_9 {dimension_numbers = #tpu.dot_dimension_numbers<[1], [0], [0], [1], [0, 0, 1, 1], [], []>} : vector<2x4xf32>, vector<4x64xf32>, vector<2x64xf32> -> vector<2x64xf32>
    %10 = arith.negf %9 : vector<2x64xf32>
    %11 = math.exp %10 : vector<2x64xf32>
    %cst_10 = arith.constant 1.000000e+00 : f32
    %12 = vector.broadcast %cst_10 : f32 to vector<2x64xf32>
    %13 = arith.addf %12, %11 : vector<2x64xf32>
    %14 = arith.divf %12, %13 : vector<2x64xf32>
    %15 = vector.shape_cast %14 : vector<2x64xf32> to vector<2x64x1xf32>
    %16 = vector.broadcast %15 : vector<2x64x1xf32> to vector<2x64x64xf32>
    %17 = arith.mulf %0, %16 : vector<2x64x64xf32>
    %c0_11 = arith.constant 0 : index
    %c0_12 = arith.constant 0 : index
    %c0_13 = arith.constant 0 : index
    %18 = vector.load %arg4[%c0_11, %c0_12, %c0_13] : memref<2x64x64xf32, #tpu.memory_space<vmem>>, vector<2x64x64xf32>
    tpu.vector_store %arg4[%c0_11, %c0_12, %c0_13], %17 {strides = array<i32>} : memref<2x64x64xf32, #tpu.memory_space<vmem>>, vector<2x64x64xf32>,
    return
  }
  func.func @transform_0(%arg0: i32) -> (i32, i32, i32) {
    %c0_i32 = arith.constant 0 : i32
    %c0_i32_0 = arith.constant 0 : i32
    %c0_i32_1 = arith.constant 0 : i32
    return %arg0, %c0_i32, %c0_i32_0 : i32, i32, i32
  }
  func.func @transform_1(%arg0: i32) -> (i32, i32) {
    %c0_i32 = arith.constant 0 : i32
    %c0_i32_0 = arith.constant 0 : i32
    %c0_i32_1 = arith.constant 0 : i32
    return %c0_i32, %c0_i32_0 : i32, i32
  }
  func.func @transform_2(%arg0: i32) -> (i32, i32) {
    %c0_i32 = arith.constant 0 : i32
    %c0_i32_0 = arith.constant 0 : i32
    %c0_i32_1 = arith.constant 0 : i32
    return %c0_i32, %c0_i32_0 : i32, i32
  }
  func.func @transform_3(%arg0: i32) -> (i32, i32, i32) {
    %c0_i32 = arith.constant 0 : i32
    %c0_i32_0 = arith.constant 0 : i32
    %c0_i32_1 = arith.constant 0 : i32
    return %arg0, %c0_i32, %c0_i32_0 : i32, i32, i32
  }
}

</mosaic_0001>

<bundles_post_ra>
// kernel: tpu_custom_call.1
= control target key start
LH: loop header
LB: loop body
LE: loop exit
PB: predicated region body
PF: predicated region fallthrough
CT: control target
= control target key end

     0   :  { %8 = vsyncpa [#allocation3], 0  ;;  %s822_s0 = inlined_call_operand.hbm [shape: f32[2,64,64], index: 0, kind: input, shape index: {}]   ;;  %s823_s1 = inlined_call_operand.vmem [shape: f32[64,4], index: 1, kind: input, shape index: {}]   ;;  %s824_s2 = inlined_call_operand.vmem [shape: f32[4,64], index: 2, kind: input, shape index: {}]   ;;  %s825_s3 = inlined_call_operand.hbm [shape: f32[2,64,64], index: 3, kind: output, shape index: {}]  }
   0x1   :  { %9 = vsyncpa [#allocation4], 0  ;;  %s617_s12 = smov [#allocation2]   ;;  %s569_s16 = scalar_lea.hbm %s822_s0, 2048 }
   0x2   :  { %s15_s13 = sshll.u32 %s617_s12, 4  ;;  %p570_p0 = scmp.ne.s32.totalorder %s822_s0, %s569_s16  ;;  %s16_s13 = int_to_ptr.vmem [resolvable:$true] %s15_s13 }
   0x3   :  { %p573_p1 = scmp.lt.u32.totalorder %s569_s16, %s822_s0 }
   0x5   :  { %p575_p2 = pnand %p573_p1, %p570_p0 }
   0x7   :  { %578 = shalt.err (!%p575_p2)
}
   0x8   :  { %s579_s21 = scalar_lea.vmem %s16_s13, 2048  ;;  %p584_p4 = scmp.lt.s32.totalorder %s16_s13, %s16_s13 }
   0x9   :  { %p580_p3 = scmp.ne.s32.totalorder %s16_s13, %s579_s21  ;;  %p585_p5 = scmp.lt.s32.totalorder %s579_s21, %s579_s21 }
   0xb   :  { %p586_p6 = por %p585_p5, %p584_p4 }
   0xd   :  { %p587_p7 = pnand %p586_p6, %p580_p3 }
   0xf   :  { %590 = shalt.err (!%p587_p7)
}
  0x10   :  { %s618_s22 = smov 128   ;;  %s619_s23 = smov 8  }
  0x11   :  { %21 = dma.hbm_to_vmem [thread:$0]  %s822_s0, 2048, %s16_s13, [#allocation3], %s618_s22, %s618_s22, %s619_s23  }
  0x12   :  { %613 = dma.done.wait [#allocation3], 2048  }
  0x13   :  { %614 = vsyncadd [#allocation3], 4294965248  ;;  %vm45_vm0 = vcmask 523264   ;;  %v659_v0 = vld [vmem:[#allocation2 + $0x40] sm:$0xff]  ;;  %v663_v2 = vld [vmem:[#allocation2 + $0x48] sm:$0xff]  ;;  %v620_v35 = vmov 0.0|0.0   ;;  %v135_v50 = vlaneseq }
  0x14   :  { %v661_v1 = vld [vmem:[#allocation2] sm:$0xff]  ;;  %v70_v3 = vsel %vm45_vm0, %v659_v0, 0.0  ;;  %v669_v5 = vld [vmem:[#allocation2 + $0x8] sm:$0xff]  ;;  %v73_v6 = vsel %vm45_vm0, %v663_v2, 0.0  ;;  %v675_v8 = vld [vmem:[#allocation2 + $0x50] sm:$0xff]  ;;  %546 = vmatprep.subr.bf16.mxu0 %v620_v35  ;;  %vm621_vm1 = vmmov 0  }
  0x15   :  { %v46_v4 = vsel %vm45_vm0, %v661_v1, 0.0  ;;  %71 = vadd.xlane.f32.xlu1 %v70_v3  ;;  %v49_v7 = vsel %vm45_vm0, %v669_v5, 0.0  ;;  %v677_v9 = vld [vmem:[#allocation2 + $0x10] sm:$0xff]  ;;  %v76_v10 = vsel %vm45_vm0, %v675_v8, 0.0  ;;  %v683_v12 = vld [vmem:[#allocation2 + $0x58] sm:$0xff]  ;;  %v691_v16 = vld [vmem:[#allocation2 + $0x60] sm:$0xff] }
  0x16   :  { %47 = vadd.xlane.f32.xlu0 %v46_v4  ;;  %v52_v11 = vsel %vm45_vm0, %v677_v9, 0.0  ;;  %v685_v13 = vld [vmem:[#allocation2 + $0x18] sm:$0xff]  ;;  %v79_v14 = vsel %vm45_vm0, %v683_v12, 0.0  ;;  %v693_v17 = vld [vmem:[#allocation2 + $0x20] sm:$0xff]  ;;  %v82_v18 = vsel %vm45_vm0, %v691_v16, 0.0  ;;  %v699_v20 = vld [vmem:[#allocation2 + $0x68] sm:$0xff] }
  0x17   :  { %v55_v15 = vsel %vm45_vm0, %v685_v13, 0.0  ;;  %v58_v19 = vsel %vm45_vm0, %v693_v17, 0.0  ;;  %v701_v21 = vld [vmem:[#allocation2 + $0x28] sm:$0xff]  ;;  %v85_v22 = vsel %vm45_vm0, %v699_v20, 0.0  ;;  %v707_v24 = vld [vmem:[#allocation2 + $0x70] sm:$0xff]  ;;  %v715_v28 = vld [vmem:[#allocation2 + $0x78] sm:$0xff] }
  0x18   :  { %v61_v23 = vsel %vm45_vm0, %v701_v21, 0.0  ;;  %v709_v25 = vld [vmem:[#allocation2 + $0x30] sm:$0xff]  ;;  %v88_v26 = vsel %vm45_vm0, %v707_v24, 0.0  ;;  %v717_v29 = vld [vmem:[#allocation2 + $0x38] sm:$0xff]  ;;  %v91_v30 = vsel %vm45_vm0, %v715_v28, 0.0  ;;  %v110_v32 = vld [vmem:[%s823_s1] sm:$0xff] }
  0x19   :  { %74 = vadd.xlane.f32.xlu1 %v73_v6  ;;  %v64_v27 = vsel %vm45_vm0, %v709_v25, 0.0  ;;  %v67_v31 = vsel %vm45_vm0, %v717_v29, 0.0  ;;  %v111_v33 = vld [vmem:[%s823_s1 + $0x8] sm:$0xff]  ;;  %v112_v36 = vld [vmem:[%s823_s1 + $0x10] sm:$0xff]  ;;  %v113_v37 = vld [vmem:[%s823_s1 + $0x18] sm:$0xff]  ;;  %v622_v45 = vmov 0.0  }
  0x1a   :  { %50 = vadd.xlane.f32.xlu0 %v49_v7  ;;  %v547_v34 = vpack.c.bf16 %v111_v33, %v110_v32  ;;  %v550_v38 = vpack.c.bf16 %v113_v37, %v112_v36  ;;  %v114_v39 = vld [vmem:[%s823_s1 + $0x20] sm:$0xff]  ;;  %v115_v40 = vld [vmem:[%s823_s1 + $0x28] sm:$0xff]  ;;  %v116_v42 = vld [vmem:[%s823_s1 + $0x30] sm:$0xff]  ;;  %538 = vmatprep.mubr.msk.f32.mxu0 %vm621_vm1, %v622_v45  ;;  %v136_v53 = vand.u32 127, %v135_v50  ;;  %v747_v54 = vshrl.u32 %v135_v50, 7 }
  0x1b   :  { %v553_v41 = vpack.c.bf16 %v115_v40, %v114_v39  ;;  %v117_v43 = vld [vmem:[%s823_s1 + $0x38] sm:$0xff]  ;;  %541 = vmatprep.subr.mxu1 %v622_v45  ;;  %543 = vmatprep.mubr.msk.f32.mxu1 %vm621_vm1, %v622_v45  ;;  %vm146_vm2 = vcmask 130112   ;;  %vm153_vm3 = vcmask 195712   ;;  %vm160_vm4 = vcmask 261312  }
  0x1c   :  { %548 = vmatpush3.bf16.msra.mxu0 %v547_v34  ;;  %v556_v44 = vpack.c.bf16 %v117_v43, %v116_v42  ;;  %v141_v57 = vadd.s32 4294967288, %v136_v53  ;;  %v148_v58 = vadd.s32 4294967280, %v136_v53  ;;  %v155_v59 = vadd.s32 4294967272, %v136_v53 }
  0x1d   :  { %77 = vadd.xlane.f32.xlu1 %v76_v10  ;;  %549 = vmatprep.subr.bf16.mxu0 %v620_v35  ;;  %v162_v60 = vadd.s32 4294967264, %v136_v53  ;;  %v139_v61 = vsub.s32 %v136_v53, %v747_v54  ;;  %v169_v6 = vadd.s32 4294967256, %v136_v53  ;;  %v176_v10 = vadd.s32 4294967248, %v136_v53 }
  0x1e   :  { %53 = vadd.xlane.f32.xlu0 %v52_v11  ;;  %v144_v3 = vsub.s32 %v141_v57, %v747_v54  ;;  %v151_v4 = vsub.s32 %v148_v58, %v747_v54  ;;  %v158_v7 = vsub.s32 %v155_v59, %v747_v54  ;;  %vm167_vm5 = vcmask 326912  }
  0x1f   :  { %v172_v32 = vsub.s32 %v169_v6, %v747_v54  ;;  %vm174_vm6 = vcmask 392512   ;;  %v183_v36 = vadd.s32 4294967240, %v136_v53  ;;  %vm181_vm7 = vcmask 458112  }
  0x20   :  { %551 = vmatpush3.bf16.msra.mxu0 %v550_v38  ;;  %vm188_vm8 = vcmask 523712   ;;  %vm229_vm9 = vcmask 1041409   ;;  %vm308_vm10 = vcmask 1043456   ;;  %vm304_vm11 = vcmask 31744  }
  0x21   :  { %80 = vadd.xlane.f32.xlu1 %v79_v14  ;;  %552 = vmatprep.subr.bf16.mxu0 %v620_v35 }
  0x22   :  { %56 = vadd.xlane.f32.xlu0 %v55_v15  ;;  %v165_v15 = vsub.s32 %v162_v60, %v747_v54 }
  0x24   :  { %554 = vmatpush3.bf16.msra.mxu0 %v553_v41 }
  0x25   :  { %83 = vadd.xlane.f32.xlu1 %v82_v18  ;;  %555 = vmatprep.subr.bf16.mxu0 %v620_v35  ;;  %v179_v35 = vsub.s32 %v176_v10, %v747_v54 }
  0x26   :  { %59 = vadd.xlane.f32.xlu0 %v58_v19 }
  0x28   :  { %557 = vmatpush3.bf16.msra.mxu0 %v556_v44 }
  0x29   :  { %86 = vadd.xlane.f32.xlu1 %v85_v22 }
  0x2a   :  { %62 = vadd.xlane.f32.xlu0 %v61_v23 }
  0x2d   :  { %89 = vadd.xlane.f32.xlu1 %v88_v26 }
  0x2e   :  { %65 = vadd.xlane.f32.xlu0 %v64_v27 }
  0x31   :  { %92 = vadd.xlane.f32.xlu1 %v91_v30 }
  0x32   :  { %68 = vadd.xlane.f32.xlu0 %v67_v31 }
  0xa2   :  { %v72_v46 = vpop.xlane.xlu1 %71 }
  0xa3   :  { %v48_v47 = vpop.xlane.xlu0 %47  ;;  %v102_v18 = vmul.f32 0.015625, %v72_v46 }
  0xa4   :  { %v94_v19 = vmul.f32 0.015625, %v48_v47 }
  0xa5   :  { %v193_v41 = vrot.slane %v102_v18, %v139_v61 }
  0xa6   :  { %v75_v48 = vpop.xlane.xlu1 %74  ;;  %v140_v42 = vrot.slane %v94_v19, %v139_v61 }
  0xa7   :  { %v51_v49 = vpop.xlane.xlu0 %50  ;;  %v103_v11 = vmul.f32 0.015625, %v75_v48 }
  0xa8   :  { %v95_v14 = vmul.f32 0.015625, %v51_v49 }
  0xa9   :  { %v197_v37 = vrot.slane %v103_v11, %v144_v3 }
  0xaa   :  { %v78_v51 = vpop.xlane.xlu1 %77  ;;  %v145_v38 = vrot.slane %v95_v14, %v144_v3 }
  0xab   :  { %v54_v52 = vpop.xlane.xlu0 %53  ;;  %v104_v22 = vmul.f32 0.015625, %v78_v51  ;;  %v198_v53 = vsel %vm146_vm2, %v197_v37, %v193_v41  ;;  %v390_v41 = vsub.s32 0, %v747_v54 }
  0xac   :  { %v96_v23 = vmul.f32 0.015625, %v54_v52 }
  0xad   :  { %v202_v43 = vrot.slane %v104_v22, %v151_v4 }
  0xae   :  { %v81_v55 = vpop.xlane.xlu1 %80  ;;  %v152_v44 = vrot.slane %v96_v23, %v151_v4 }
  0xaf   :  { %v57_v56 = vpop.xlane.xlu0 %56  ;;  %v105_v30 = vmul.f32 0.015625, %v81_v55  ;;  %v186_v55 = vsub.s32 %v183_v36, %v747_v54  ;;  %v203_v59 = vsel %vm153_vm3, %v202_v43, %v198_v53 }
  0xb0   :  { %v97_v31 = vmul.f32 0.015625, %v57_v56  ;;  %v147_v56 = vsel %vm146_vm2, %v145_v38, %v140_v42 }
  0xb1   :  { %v207_v47 = vrot.slane %v105_v30, %v158_v7  ;;  %v154_v60 = vsel %vm153_vm3, %v152_v44, %v147_v56  ;;  %v425_v44 = vsub.s32 1, %v747_v54 }
  0xb2   :  { %v84_v62 = vpop.xlane.xlu1 %83  ;;  %v159_v48 = vrot.slane %v97_v31, %v158_v7 }
  0xb3   :  { %v60_v63 = vpop.xlane.xlu0 %59  ;;  %v106_v33 = vmul.f32 0.015625, %v84_v62  ;;  %v208_v4 = vsel %vm160_vm4, %v207_v47, %v203_v59 }
  0xb4   :  { %v98_v34 = vmul.f32 0.015625, %v60_v63  ;;  %v161_v6 = vsel %vm160_vm4, %v159_v48, %v154_v60 }
  0xb5   :  { %v212_v51 = vrot.slane %v106_v33, %v165_v15 }
  0xb6   :  { %v87_v26 = vpop.xlane.xlu1 %86  ;;  %v166_v52 = vrot.slane %v98_v34, %v165_v15 }
  0xb7   :  { %v63_v27 = vpop.xlane.xlu0 %62  ;;  %v107_v39 = vmul.f32 0.015625, %v87_v26  ;;  %v213_v11 = vsel %vm167_vm5, %v212_v51, %v208_v4 }
  0xb8   :  { %v99_v40 = vmul.f32 0.015625, %v63_v27  ;;  %v168_v14 = vsel %vm167_vm5, %v166_v52, %v161_v6 }
  0xb9   :  { %v217_v57 = vrot.slane %v107_v39, %v172_v32 }
  0xba   :  { %v90_v45 = vpop.xlane.xlu1 %89  ;;  %v173_v58 = vrot.slane %v99_v40, %v172_v32  ;;  %v118_v32 = vld [vmem:[%s824_s2] sm:$0xf]  ;;  %s623_s2 = smov [#allocation5]  }
  0xbb   :  { %v66_v46 = vpop.xlane.xlu0 %65  ;;  %v108_v49 = vmul.f32 0.015625, %v90_v45  ;;  %v218_v15 = vsel %vm174_vm6, %v217_v57, %v213_v11  ;;  %542 = vmatpush3.msk.msra.mxu1 %vm308_vm10, %v118_v32  ;;  %s495_s15 = sshll.u32 %s623_s2, 4  ;;  %s496_s15 = int_to_ptr.vmem [resolvable:$true] %s495_s15 }
  0xbc   :  { %v100_v50 = vmul.f32 0.015625, %v66_v46  ;;  %v175_v18 = vsel %vm174_vm6, %v173_v58, %v168_v14  ;;  %s591_s16 = scalar_lea.vmem %s496_s15, 2048  ;;  %p596_p9 = scmp.lt.s32.totalorder %s496_s15, %s496_s15 }
  0xbd   :  { %v222_v61 = vrot.slane %v108_v49, %v179_v35  ;;  %p592_p8 = scmp.ne.s32.totalorder %s496_s15, %s591_s16  ;;  %p597_p10 = scmp.lt.s32.totalorder %s591_s16, %s591_s16 }
  0xbe   :  { %v180_v62 = vrot.slane %v100_v50, %v179_v35  ;;  %v93_v63 = vpop.xlane.xlu1 %92 }
  0xbf   :  { %v69_v3 = vpop.xlane.xlu0 %68  ;;  %v109_v7 = vmul.f32 0.015625, %v93_v63  ;;  %v223_v23 = vsel %vm181_vm7, %v222_v61, %v218_v15  ;;  %p598_p11 = por %p597_p10, %p596_p9 }
  0xc0   :  { %v101_v10 = vmul.f32 0.015625, %v69_v3  ;;  %v182_v26 = vsel %vm181_vm7, %v180_v62, %v175_v18 }
  0xc1   :  { %v227_v19 = vrot.slane %v109_v7, %v186_v55  ;;  %p599_p12 = pnand %p598_p11, %p592_p8 }
  0xc2   :  { %v187_v22 = vrot.slane %v101_v10, %v186_v55 }
  0xc3   :  { %v228_v30 = vsel %vm188_vm8, %v227_v19, %v223_v23 }
  0xc4   :  { %v189_v27 = vsel %vm188_vm8, %v187_v22, %v182_v26 }
  0xc5   :  { %v230_v31 = vsel %vm229_vm9, %v228_v30, %v189_v27 }
  0xc6   :  { %539 = vmatmul.mubr.msk.f32.vlgmr.msra.gmra.mrb[0].mxu0 %vm45_vm0, %v230_v31 }
 0x199   :  { %v299_v33 = vpop.f32.mrb[0].mxu0 }
 0x19a   :  { %v303_v34 = vmax.f32 %v299_v33, 0.0  ;;  %v540_v35 = vpop.f32.mrb[1].mxu0 }
 0x19c   :  { %544 = vmatmul.mubr.msk.f32.vlgmr.msra.gmra.mrb[0].mxu1 %vm304_vm11, %v303_v34 }
 0x26f   :  { %v378_v36 = vpop.f32.mrb[0].mxu1 }
 0x270   :  { %v510_v37 = vmul.f32 -1.442695, %v378_v36  ;;  %v545_v38 = vpop.f32.mrb[1].mxu1 }
 0x272   :  { %565 = vpow2.f32 %v510_v37 }
 0x27c   :  { %v566_v39 = vpop.eup %565 }
 0x27d   :  { %v385_v40 = vadd.f32 1.0, %v566_v39 }
 0x27f   :  { %567 = vrcp.f32 %v385_v40 }
 0x289   :  { %v568_v42 = vpop.eup %567 }
 0x28a   :  { %v391_v43 = vrot.slane %v568_v42, %v390_v41  ;;  %v426_v45 = vrot.slane %v568_v42, %v425_v44 }
 0x28c   :  { %397 = vbcast.lane.b32.xlu1 %v391_v43, 264  ;;  %393 = vbcast.lane.b32.xlu0 %v391_v43, 256 }
 0x290   :  { %401 = vbcast.lane.b32.xlu1 %v391_v43, 272  ;;  %409 = vbcast.lane.b32.xlu0 %v391_v43, 288 }
 0x294   :  { %405 = vbcast.lane.b32.xlu1 %v391_v43, 280  ;;  %417 = vbcast.lane.b32.xlu0 %v391_v43, 304 }
 0x298   :  { %413 = vbcast.lane.b32.xlu1 %v391_v43, 296  ;;  %428 = vbcast.lane.b32.xlu0 %v426_v45, 256 }
 0x29c   :  { %421 = vbcast.lane.b32.xlu1 %v391_v43, 312  ;;  %436 = vbcast.lane.b32.xlu0 %v426_v45, 272 }
 0x2a0   :  { %432 = vbcast.lane.b32.xlu1 %v426_v45, 264  ;;  %444 = vbcast.lane.b32.xlu0 %v426_v45, 288 }
 0x2a4   :  { %440 = vbcast.lane.b32.xlu1 %v426_v45, 280  ;;  %452 = vbcast.lane.b32.xlu0 %v426_v45, 304 }
 0x2a8   :  { %448 = vbcast.lane.b32.xlu1 %v426_v45, 296 }
 0x2ac   :  { %456 = vbcast.lane.b32.xlu1 %v426_v45, 312 }
 0x2fe   :  { %v398_v46 = vpop.permute.xlu1 %397  ;;  %v394_v47 = vpop.permute.xlu0 %393 }
 0x2ff   :  { %v459_v48 = vmul.f32 %v398_v46, %v669_v5  ;;  %v458_v49 = vmul.f32 %v394_v47, %v661_v1 }
 0x301   :  { %475 = vst.msk [vmem:[#allocation5 + $0x8] sm:$0xff] %vm45_vm0, %v459_v48  ;;  %474 = vst.msk [vmem:[#allocation5] sm:$0xff] %vm45_vm0, %v458_v49 }
 0x302   :  { %v402_v54 = vpop.permute.xlu1 %401  ;;  %v410_v50 = vpop.permute.xlu0 %409 }
 0x303   :  { %v460_v51 = vmul.f32 %v402_v54, %v677_v9  ;;  %v462_v52 = vmul.f32 %v410_v50, %v693_v17 }
 0x305   :  { %476 = vst.msk [vmem:[#allocation5 + $0x10] sm:$0xff] %vm45_vm0, %v460_v51  ;;  %478 = vst.msk [vmem:[#allocation5 + $0x20] sm:$0xff] %vm45_vm0, %v462_v52 }
 0x306   :  { %v406_v55 = vpop.permute.xlu1 %405  ;;  %v418_v53 = vpop.permute.xlu0 %417 }
 0x307   :  { %v461_v5 = vmul.f32 %v406_v55, %v685_v13  ;;  %v464_v1 = vmul.f32 %v418_v53, %v709_v25 }
 0x309   :  { %477 = vst.msk [vmem:[#allocation5 + $0x18] sm:$0xff] %vm45_vm0, %v461_v5  ;;  %480 = vst.msk [vmem:[#allocation5 + $0x30] sm:$0xff] %vm45_vm0, %v464_v1 }
 0x30a   :  { %v414_v56 = vpop.permute.xlu1 %413  ;;  %v429_v57 = vpop.permute.xlu0 %428 }
 0x30b   :  { %v463_v9 = vmul.f32 %v414_v56, %v701_v21  ;;  %v466_v17 = vmul.f32 %v429_v57, %v659_v0 }
 0x30d   :  { %479 = vst.msk [vmem:[#allocation5 + $0x28] sm:$0xff] %vm45_vm0, %v463_v9  ;;  %482 = vst.msk [vmem:[#allocation5 + $0x40] sm:$0xff] %vm45_vm0, %v466_v17 }
 0x30e   :  { %v422_v58 = vpop.permute.xlu1 %421  ;;  %v437_v59 = vpop.permute.xlu0 %436 }
 0x30f   :  { %v465_v13 = vmul.f32 %v422_v58, %v717_v29  ;;  %v468_v25 = vmul.f32 %v437_v59, %v675_v8 }
 0x311   :  { %481 = vst.msk [vmem:[#allocation5 + $0x38] sm:$0xff] %vm45_vm0, %v465_v13  ;;  %484 = vst.msk [vmem:[#allocation5 + $0x50] sm:$0xff] %vm45_vm0, %v468_v25 }
 0x312   :  { %v433_v60 = vpop.permute.xlu1 %432  ;;  %v445_v61 = vpop.permute.xlu0 %444 }
 0x313   :  { %v467_v21 = vmul.f32 %v433_v60, %v663_v2  ;;  %v470_v0 = vmul.f32 %v445_v61, %v691_v16 }
 0x315   :  { %483 = vst.msk [vmem:[#allocation5 + $0x48] sm:$0xff] %vm45_vm0, %v467_v21  ;;  %486 = vst.msk [vmem:[#allocation5 + $0x60] sm:$0xff] %vm45_vm0, %v470_v0 }
 0x316   :  { %v441_v62 = vpop.permute.xlu1 %440  ;;  %v453_v63 = vpop.permute.xlu0 %452 }
 0x317   :  { %v469_v29 = vmul.f32 %v441_v62, %v683_v12  ;;  %v472_v8 = vmul.f32 %v453_v63, %v707_v24 }
 0x319   :  { %485 = vst.msk [vmem:[#allocation5 + $0x58] sm:$0xff] %vm45_vm0, %v469_v29  ;;  %488 = vst.msk [vmem:[#allocation5 + $0x70] sm:$0xff] %vm45_vm0, %v472_v8 }
 0x31a   :  { %v449_v3 = vpop.permute.xlu1 %448 }
 0x31b   :  { %v471_v4 = vmul.f32 %v449_v3, %v699_v20 }
 0x31d   :  { %487 = vst.msk [vmem:[#allocation5 + $0x68] sm:$0xff] %vm45_vm0, %v471_v4 }
 0x31e   :  { %v457_v2 = vpop.permute.xlu1 %456 }
 0x31f   :  { %v473_v16 = vmul.f32 %v457_v2, %v715_v28 }
 0x321   :  { %489 = vst.msk [vmem:[#allocation5 + $0x78] sm:$0xff] %vm45_vm0, %v473_v16 }
 0x322   :  { %602 = shalt.err (!%p599_p12)
}
 0x323   :  { %s603_s19 = scalar_lea.hbm %s825_s3, 2048 }
 0x324   :  { %p604_p13 = scmp.ne.s32.totalorder %s825_s3, %s603_s19  ;;  %p607_p0 = scmp.lt.u32.totalorder %s603_s19, %s825_s3 }
 0x326   :  { %p609_p1 = pnand %p607_p0, %p604_p13 }
 0x328   :  { %612 = shalt.err (!%p609_p1)
}
 0x329   :  { %501 = dma.vmem_to_hbm [thread:$0]  %s496_s15, 2048, %s825_s3, [#allocation4], %s618_s22, %s618_s22, %s619_s23  }
 0x32a   :  { %615 = dma.done.wait [#allocation4], 2048  }
 0x32b   :  { %616 = vsyncadd [#allocation4], 4294965248 }
 0x32c   :  { %505 = vsyncpa [#allocation3], 1 }
 0x32d   :  { %506 = vsyncpa [#allocation4], 1 }

</bundles_post_ra>
